<compile_context>
chip_gen: v5e
topology: v5e:2x2
jax: 0.10.0
libtpu: 0.0.40
codegen_flags: <defaults>
</compile_context>

<pallas_src>
import jax
import jax.numpy as jnp
import numpy as np
from jax.experimental import pallas as pl
from jax.experimental.pallas import tpu as pltpu


# ----------------------------- Pallas kernel --------------------------------
def _make_gru_kernel(batch, vocab, hidden, out_dim, slab):
    pad = slab - hidden - out_dim

    def kernel(ids_ref, emb_ref, h0_ref, wg_ref, bg_ref, wd_ref, bd_ref,
               out_ref, h_scr):
        t = pl.program_id(0)

        # Initialize the VMEM-resident hidden-state carry on the first step.
        @pl.when(t == 0)
        def _init():
            h_scr[...] = h0_ref[...]

        h = h_scr[...]                                        # (B, H)

        # In-kernel embedding gather as a one-hot matmul against the
        # VMEM-resident (V, H) table (ids come from SMEM scalar prefetch).
        id_col = jnp.concatenate(
            [jnp.full((1, 1), ids_ref[t, b], jnp.int32) for b in range(batch)],
            axis=0)                                           # (B, 1)
        col = jax.lax.broadcasted_iota(jnp.int32, (batch, vocab), 1)
        onehot = (col == id_col).astype(jnp.float32)          # (B, V)
        x = jnp.dot(onehot, emb_ref[...],
                    preferred_element_type=jnp.float32)       # (B, H)

        # Single fused gate matmul: (B, 2H) @ (2H, 4H)
        #   columns = [ i_r+h_r | i_z+h_z | i_n | h_n ]  (biases pre-packed).
        xh = jnp.concatenate([x, h], axis=1)                  # (B, 2H)
        gates = (jnp.dot(xh, wg_ref[...], preferred_element_type=jnp.float32)
                 + bg_ref[...])                               # (B, 4H)

        r = jax.nn.sigmoid(gates[:, :hidden])
        z = jax.nn.sigmoid(gates[:, hidden:2 * hidden])
        n = jnp.tanh(gates[:, 2 * hidden:3 * hidden]
                     + r * gates[:, 3 * hidden:4 * hidden])
        h_new = (1.0 - z) * n + z * h                         # (B, H)
        h_scr[...] = h_new

        # Decoder + lane-dense 128-wide output slab [h_new | logits | 0-pad].
        logits = (jnp.dot(h_new, wd_ref[...], preferred_element_type=jnp.float32)
                  + bd_ref[...])                              # (B, O)
        pieces = [h_new, logits]
        if pad:
            pieces.append(jnp.zeros((batch, pad), jnp.float32))
        out_ref[0] = jnp.concatenate(pieces, axis=1)          # (B, SLAB)

    return kernel


def gru_sequence(packed, ids, h0):
    """Run T GRU steps + decoder in one pallas_call.

    ids: (T, B) int32 token ids.  h0: (B, H) f32 initial hidden.
    Returns (T, B, SLAB) slab; lanes [0:H] = hidden after step t,
    lanes [H:H+O] = logits at step t, rest zero padding.
    """
    T, B = ids.shape
    H = h0.shape[-1]
    V = packed["embedding"].shape[0]
    O = packed["w_dec"].shape[1]
    SLAB = packed["slab"]

    kernel = _make_gru_kernel(B, V, H, O, SLAB)
    out = pl.pallas_call(
        kernel,
        out_shape=jax.ShapeDtypeStruct((T, B, SLAB), jnp.float32),
        grid_spec=pltpu.PrefetchScalarGridSpec(
            num_scalar_prefetch=1,
            grid=(T,),
            in_specs=[
                # Constant index_maps -> weights / table / h0 stay VMEM-resident
                # across all T steps (DMA'd once).
                pl.BlockSpec((V, H), lambda t, ids_ref: (0, 0)),          # embedding
                pl.BlockSpec((B, H), lambda t, ids_ref: (0, 0)),          # h0
                pl.BlockSpec((2 * H, 4 * H), lambda t, ids_ref: (0, 0)),  # packed GRU W
                pl.BlockSpec((1, 4 * H), lambda t, ids_ref: (0, 0)),      # packed GRU b
                pl.BlockSpec((H, O), lambda t, ids_ref: (0, 0)),          # decoder W
                pl.BlockSpec((1, O), lambda t, ids_ref: (0, 0)),          # decoder b
            ],
            out_specs=pl.BlockSpec((1, B, SLAB), lambda t, ids_ref: (t, 0, 0)),
            scratch_shapes=[pltpu.VMEM((B, H), jnp.float32)],             # hidden carry
        ),
        compiler_params=pltpu.CompilerParams(
            dimension_semantics=("arbitrary",)),  # sequential recurrence over time
    )(ids, packed["embedding"], h0,
      packed["w_gru"], packed["b_gru"], packed["w_dec"], packed["b_dec"])
    return out


# ----------------------------- Parameter handling ----------------------------
def init_char_rnn_params(key, input_size, hidden_size, output_size):
    """Raw per-gate parameters matching nn.Embedding / nn.GRU / nn.Linear shapes."""
    H, O, V = hidden_size, output_size, input_size
    keys = jax.random.split(key, 16)
    bound = 1.0 / np.sqrt(H)

    def u(k, shape):
        return jax.random.uniform(k, shape, jnp.float32, -bound, bound)

    return {
        # nn.Embedding(input_size, hidden_size): weight (V, H), N(0,1) init
        "embedding": jax.random.normal(keys[0], (V, H), jnp.float32),
        # nn.GRU(H, H, 1) gate order [r, z, n]; stored per-gate, pre-transposed (in, out)
        "w_ir": u(keys[1], (H, H)), "w_iz": u(keys[2], (H, H)), "w_in": u(keys[3], (H, H)),
        "w_hr": u(keys[4], (H, H)), "w_hz": u(keys[5], (H, H)), "w_hn": u(keys[6], (H, H)),
        "b_ir": u(keys[7], (1, H)), "b_iz": u(keys[8], (1, H)), "b_in": u(keys[9], (1, H)),
        "b_hr": u(keys[10], (1, H)), "b_hz": u(keys[11], (1, H)), "b_hn": u(keys[12], (1, H)),
        # nn.Linear(H, O): weight stored transposed (H, O), bias (1, O)
        "w_dec": u(keys[13], (H, O)),
        "b_dec": u(keys[14], (1, O)),
    }


def pack_params(raw):
    """Pre-pack GRU weights for the single fused gate matmul."""
    H = raw["w_ir"].shape[0]
    O = raw["w_dec"].shape[1]
    zero_hh = jnp.zeros((H, H), jnp.float32)
    # Columns: [ r-sum | z-sum | i_n | h_n ], rows: [input-side; hidden-side].
    w_gru = jnp.concatenate([
        jnp.concatenate([raw["w_ir"], raw["w_hr"]], axis=0),
        jnp.concatenate([raw["w_iz"], raw["w_hz"]], axis=0),
        jnp.concatenate([raw["w_in"], zero_hh], axis=0),
        jnp.concatenate([zero_hh, raw["w_hn"]], axis=0),
    ], axis=1)                                                # (2H, 4H)
    b_gru = jnp.concatenate([
        raw["b_ir"] + raw["b_hr"],
        raw["b_iz"] + raw["b_hz"],
        raw["b_in"],
        raw["b_hn"],
    ], axis=1)                                                # (1, 4H)
    slab = max(128, -(-(H + O) // 128) * 128)                 # lane-dense output width
    return {
        "embedding": raw["embedding"],
        "w_gru": w_gru, "b_gru": b_gru,
        "w_dec": raw["w_dec"], "b_dec": raw["b_dec"],
        "slab": slab,
    }


# ----------------------------- Model wrappers --------------------------------
def char_rnn_forward(packed, input_ids, hidden):
    """Pallas-backed CharRNN.forward (model='gru', n_layers=1), single step.

    input_ids: (B,) int32; hidden: (1, B, H) f32.
    returns (logits (B, O), new_hidden (1, B, H)).
    """
    H = hidden.shape[-1]
    O = packed["w_dec"].shape[1]
    out = gru_sequence(packed, input_ids[None, :].astype(jnp.int32), hidden[0])
    h_new = out[0, :, :H]
    logits = out[0, :, H:H + O]
    return logits, h_new[None, :, :]


def char_rnn_forward_sequence(packed, ids, hidden):
    """Fused multi-step variant (typical generation loop): ids (T, B)."""
    H = hidden.shape[-1]
    O = packed["w_dec"].shape[1]
    out = gru_sequence(packed, ids.astype(jnp.int32), hidden[0])
    logits = out[:, :, H:H + O]          # (T, B, O)
    h_final = out[-1, :, :H]             # (B, H)
    return logits, h_final[None, :, :]


# ----------------------------- Pure-JAX reference ----------------------------
def _gru_cell_reference(raw, x, h):
    i_r = x @ raw["w_ir"] + raw["b_ir"]
    i_z = x @ raw["w_iz"] + raw["b_iz"]
    i_n = x @ raw["w_in"] + raw["b_in"]
    h_r = h @ raw["w_hr"] + raw["b_hr"]
    h_z = h @ raw["w_hz"] + raw["b_hz"]
    h_n = h @ raw["w_hn"] + raw["b_hn"]
    r = jax.nn.sigmoid(i_r + h_r)
    z = jax.nn.sigmoid(i_z + h_z)
    n = jnp.tanh(i_n + r * h_n)
    return (1.0 - z) * n + z * h


def char_rnn_reference(raw, input_ids, hidden):
    x = jnp.take(raw["embedding"], input_ids, axis=0)
    h_new = _gru_cell_reference(raw, x, hidden[0])
    logits = h_new @ raw["w_dec"] + raw["b_dec"]
    return logits, h_new[None, :, :]


def sequence_reference(raw, ids, hidden):
    h = hidden[0]
    logits_list = []
    for t in range(ids.shape[0]):
        x = jnp.take(raw["embedding"], ids[t], axis=0)
        h = _gru_cell_reference(raw, x, h)
        logits_list.append(h @ raw["w_dec"] + raw["b_dec"])
    return jnp.stack(logits_list, axis=0), h[None, :, :]


# ----------------------------------- Main -------------------------------------
if __name__ == "__main__":
    INPUT_SIZE = 64    # vocab size
    HIDDEN_SIZE = 32
    OUTPUT_SIZE = 64
    BATCH = 2
    SEQ = 6

    key = jax.random.PRNGKey(0)
    pkey, ikey, skey = jax.random.split(key, 3)
    raw = init_char_rnn_params(pkey, INPUT_SIZE, HIDDEN_SIZE, OUTPUT_SIZE)
    packed = pack_params(raw)

    # --- single step: exact CharRNN.forward semantics -------------------------
    input_ids = jax.random.randint(ikey, (BATCH,), 0, INPUT_SIZE, dtype=jnp.int32)
    hidden0 = jnp.zeros((1, BATCH, HIDDEN_SIZE), jnp.float32)  # init_hidden

    logits, hidden1 = jax.block_until_ready(
        char_rnn_forward(packed, input_ids, hidden0))
    ref_logits, ref_hidden1 = char_rnn_reference(raw, input_ids, hidden0)

    assert logits.shape == (BATCH, OUTPUT_SIZE)
    assert hidden1.shape == (1, BATCH, HIDDEN_SIZE)
    np.testing.assert_allclose(np.asarray(logits), np.asarray(ref_logits),
                               rtol=1e-5, atol=1e-5)
    np.testing.assert_allclose(np.asarray(hidden1), np.asarray(ref_hidden1),
                               rtol=1e-5, atol=1e-5)

    # --- fused multi-step (in-kernel time loop, weights resident in VMEM) -----
    seq_ids = jax.random.randint(skey, (SEQ, BATCH), 0, INPUT_SIZE, dtype=jnp.int32)
    seq_logits, seq_hidden = jax.block_until_ready(
        char_rnn_forward_sequence(packed, seq_ids, hidden0))
    ref_seq_logits, ref_seq_hidden = sequence_reference(raw, seq_ids, hidden0)

    assert seq_logits.shape == (SEQ, BATCH, OUTPUT_SIZE)
    assert seq_hidden.shape == (1, BATCH, HIDDEN_SIZE)
    np.testing.assert_allclose(np.asarray(seq_logits), np.asarray(ref_seq_logits),
                               rtol=1e-5, atol=1e-5)
    np.testing.assert_allclose(np.asarray(seq_hidden), np.asarray(ref_seq_hidden),
                               rtol=1e-5, atol=1e-5)

    print("KERNEL_OK")
</pallas_src>

<mosaic_0001>
module attributes {stable_mosaic.version = 11 : i64} {
  func.func @kernel(%arg0: i32, %arg1: memref<1x2xi32, #tpu.memory_space<smem>>, %arg2: memref<64x32xf32, #tpu.memory_space<vmem>>, %arg3: memref<2x32xf32, #tpu.memory_space<vmem>>, %arg4: memref<64x128xf32, #tpu.memory_space<vmem>>, %arg5: memref<1x128xf32, #tpu.memory_space<vmem>>, %arg6: memref<32x64xf32, #tpu.memory_space<vmem>>, %arg7: memref<1x64xf32, #tpu.memory_space<vmem>>, %arg8: memref<1x2x128xf32, #tpu.memory_space<vmem>>, %arg9: memref<2x32xf32, #tpu.memory_space<vmem>>) attributes {dimension_semantics = [#tpu.dimension_semantics<arbitrary>], iteration_bounds = array<i64: 1>, scalar_prefetch = 1 : i64, scratch_operands = 1 : i64, tpu.core_type = #tpu.core_type<tc>, window_params = [{pipeline_mode = #tpu.pipeline_mode<synchronous>, transform_indices = @transform_0, window_bounds = array<i64: 64, 32>}, {pipeline_mode = #tpu.pipeline_mode<synchronous>, transform_indices = @transform_1, window_bounds = array<i64: 2, 32>}, {pipeline_mode = #tpu.pipeline_mode<synchronous>, transform_indices = @transform_2, window_bounds = array<i64: 64, 128>}, {pipeline_mode = #tpu.pipeline_mode<synchronous>, transform_indices = @transform_3, window_bounds = array<i64: 1, 128>}, {pipeline_mode = #tpu.pipeline_mode<synchronous>, transform_indices = @transform_4, window_bounds = array<i64: 32, 64>}, {pipeline_mode = #tpu.pipeline_mode<synchronous>, transform_indices = @transform_5, window_bounds = array<i64: 1, 64>}, {transform_indices = @transform_6, window_bounds = array<i64: 1, 2, 128>}]} {
    %c0_i32 = arith.constant 0 : i32
    %0 = arith.cmpi eq, %arg0, %c0_i32 : i32
    %1 = arith.extui %0 : i1 to i32
    %c0_i32_0 = arith.constant 0 : i32
    %2 = arith.cmpi ne, %1, %c0_i32_0 : i32
    scf.if %2 {
      %c0_24 = arith.constant 0 : index
      %c0_25 = arith.constant 0 : index
      %57 = vector.load %arg3[%c0_24, %c0_25] : memref<2x32xf32, #tpu.memory_space<vmem>>, vector<2x32xf32>
      %c0_26 = arith.constant 0 : index
      %c0_27 = arith.constant 0 : index
      %58 = vector.load %arg9[%c0_26, %c0_27] : memref<2x32xf32, #tpu.memory_space<vmem>>, vector<2x32xf32>
      tpu.vector_store %arg9[%c0_26, %c0_27], %57 {strides = array<i32>} : memref<2x32xf32, #tpu.memory_space<vmem>>, vector<2x32xf32>,
    } else {
    }
    %c0 = arith.constant 0 : index
    %c0_1 = arith.constant 0 : index
    %3 = vector.load %arg9[%c0, %c0_1] : memref<2x32xf32, #tpu.memory_space<vmem>>, vector<2x32xf32>
    %4 = arith.index_cast %arg0 : i32 to index
    %c0_2 = arith.constant 0 : index
    %5 = memref.load %arg1[%4, %c0_2] : memref<1x2xi32, #tpu.memory_space<smem>>
    %6 = vector.broadcast %5 : i32 to vector<1x1xi32>
    %7 = arith.index_cast %arg0 : i32 to index
    %c1 = arith.constant 1 : index
    %8 = memref.load %arg1[%7, %c1] : memref<1x2xi32, #tpu.memory_space<smem>>
    %9 = vector.broadcast %8 : i32 to vector<1x1xi32>
    %10 = tpu.concatenate %6, %9 in 0 : vector<1x1xi32>, vector<1x1xi32> -> vector<2x1xi32>
    %11 = tpu.iota {dimensions = array<i32: 1>} : vector<2x64xi32>
    %12 = vector.broadcast %10 : vector<2x1xi32> to vector<2x64xi32>
    %13 = arith.cmpi eq, %11, %12 : vector<2x64xi32>
    %14 = arith.extui %13 : vector<2x64xi1> to vector<2x64xi32>
    %15 = arith.sitofp %14 : vector<2x64xi32> to vector<2x64xf32>
    %c0_3 = arith.constant 0 : index
    %c0_4 = arith.constant 0 : index
    %16 = vector.load %arg2[%c0_3, %c0_4] : memref<64x32xf32, #tpu.memory_space<vmem>>, vector<64x32xf32>
    %cst = arith.constant dense<0.000000e+00> : vector<2x32xf32>
    %17 = tpu.matmul %15, %16, %cst {dimension_numbers = #tpu.dot_dimension_numbers<[1], [0], [0], [1], [0, 0, 1, 1], [], []>} : vector<2x64xf32>, vector<64x32xf32>, vector<2x32xf32> -> vector<2x32xf32>
    %18 = tpu.concatenate %17, %3 in 1 : vector<2x32xf32>, vector<2x32xf32> -> vector<2x64xf32>
    %c0_5 = arith.constant 0 : index
    %c0_6 = arith.constant 0 : index
    %19 = vector.load %arg4[%c0_5, %c0_6] : memref<64x128xf32, #tpu.memory_space<vmem>>, vector<64x128xf32>
    %cst_7 = arith.constant dense<0.000000e+00> : vector<2x128xf32>
    %20 = tpu.matmul %18, %19, %cst_7 {dimension_numbers = #tpu.dot_dimension_numbers<[1], [0], [0], [1], [0, 0, 1, 1], [], []>} : vector<2x64xf32>, vector<64x128xf32>, vector<2x128xf32> -> vector<2x128xf32>
    %c0_8 = arith.constant 0 : index
    %c0_9 = arith.constant 0 : index
    %21 = vector.load %arg5[%c0_8, %c0_9] : memref<1x128xf32, #tpu.memory_space<vmem>>, vector<1x128xf32>
    %22 = vector.broadcast %21 : vector<1x128xf32> to vector<2x128xf32>
    %23 = arith.addf %20, %22 : vector<2x128xf32>
    %24 = vector.extract_strided_slice %23 {offsets = [0, 0], sizes = [2, 32], strides = [1, 1]} : vector<2x128xf32> to vector<2x32xf32>
    %25 = arith.negf %24 : vector<2x32xf32>
    %26 = math.exp %25 : vector<2x32xf32>
    %cst_10 = arith.constant 1.000000e+00 : f32
    %27 = vector.broadcast %cst_10 : f32 to vector<2x32xf32>
    %28 = arith.addf %27, %26 : vector<2x32xf32>
    %29 = arith.divf %27, %28 : vector<2x32xf32>
    %30 = vector.extract_strided_slice %23 {offsets = [0, 32], sizes = [2, 32], strides = [1, 1]} : vector<2x128xf32> to vector<2x32xf32>
    %31 = arith.negf %30 : vector<2x32xf32>
    %32 = math.exp %31 : vector<2x32xf32>
    %cst_11 = arith.constant 1.000000e+00 : f32
    %33 = vector.broadcast %cst_11 : f32 to vector<2x32xf32>
    %34 = arith.addf %33, %32 : vector<2x32xf32>
    %35 = arith.divf %33, %34 : vector<2x32xf32>
    %36 = vector.extract_strided_slice %23 {offsets = [0, 64], sizes = [2, 32], strides = [1, 1]} : vector<2x128xf32> to vector<2x32xf32>
    %37 = vector.extract_strided_slice %23 {offsets = [0, 96], sizes = [2, 32], strides = [1, 1]} : vector<2x128xf32> to vector<2x32xf32>
    %38 = arith.mulf %29, %37 : vector<2x32xf32>
    %39 = arith.addf %36, %38 : vector<2x32xf32>
    %40 = math.tanh %39 : vector<2x32xf32>
    %cst_12 = arith.constant 1.000000e+00 : f32
    %41 = vector.broadcast %cst_12 : f32 to vector<2x32xf32>
    %42 = arith.subf %41, %35 : vector<2x32xf32>
    %43 = arith.mulf %42, %40 : vector<2x32xf32>
    %44 = arith.mulf %35, %3 : vector<2x32xf32>
    %45 = arith.addf %43, %44 : vector<2x32xf32>
    %c0_13 = arith.constant 0 : index
    %c0_14 = arith.constant 0 : index
    %46 = vector.load %arg9[%c0_13, %c0_14] : memref<2x32xf32, #tpu.memory_space<vmem>>, vector<2x32xf32>
    tpu.vector_store %arg9[%c0_13, %c0_14], %45 {strides = array<i32>} : memref<2x32xf32, #tpu.memory_space<vmem>>, vector<2x32xf32>,
    %c0_15 = arith.constant 0 : index
    %c0_16 = arith.constant 0 : index
    %47 = vector.load %arg6[%c0_15, %c0_16] : memref<32x64xf32, #tpu.memory_space<vmem>>, vector<32x64xf32>
    %cst_17 = arith.constant dense<0.000000e+00> : vector<2x64xf32>
    %48 = tpu.matmul %45, %47, %cst_17 {dimension_numbers = #tpu.dot_dimension_numbers<[1], [0], [0], [1], [0, 0, 1, 1], [], []>} : vector<2x32xf32>, vector<32x64xf32>, vector<2x64xf32> -> vector<2x64xf32>
    %c0_18 = arith.constant 0 : index
    %c0_19 = arith.constant 0 : index
    %49 = vector.load %arg7[%c0_18, %c0_19] : memref<1x64xf32, #tpu.memory_space<vmem>>, vector<1x64xf32>
    %50 = vector.broadcast %49 : vector<1x64xf32> to vector<2x64xf32>
    %51 = arith.addf %48, %50 : vector<2x64xf32>
    %cst_20 = arith.constant 0.000000e+00 : f32
    %52 = vector.broadcast %cst_20 : f32 to vector<2x32xf32>
    %53 = tpu.concatenate %45, %51, %52 in 1 : vector<2x32xf32>, vector<2x64xf32>, vector<2x32xf32> -> vector<2x128xf32>
    %c0_21 = arith.constant 0 : index
    %c0_22 = arith.constant 0 : index
    %c0_23 = arith.constant 0 : index
    %54 = vector.load %arg8[%c0_21, %c0_22, %c0_23] : memref<1x2x128xf32, #tpu.memory_space<vmem>>, vector<1x2x128xf32>
    %55 = vector.shape_cast %54 : vector<1x2x128xf32> to vector<2x128xf32>
    %56 = vector.shape_cast %53 : vector<2x128xf32> to vector<1x2x128xf32>
    tpu.vector_store %arg8[%c0_21, %c0_22, %c0_23], %56 {strides = array<i32>} : memref<1x2x128xf32, #tpu.memory_space<vmem>>, vector<1x2x128xf32>,
    return
  }
  func.func @transform_0(%arg0: i32, %arg1: memref<1x2xi32, #tpu.memory_space<smem>>) -> (i32, i32) {
    %c0_i32 = arith.constant 0 : i32
    %c0_i32_0 = arith.constant 0 : i32
    %c0_i32_1 = arith.constant 0 : i32
    return %c0_i32, %c0_i32_0 : i32, i32
  }
  func.func @transform_1(%arg0: i32, %arg1: memref<1x2xi32, #tpu.memory_space<smem>>) -> (i32, i32) {
    %c0_i32 = arith.constant 0 : i32
    %c0_i32_0 = arith.constant 0 : i32
    %c0_i32_1 = arith.constant 0 : i32
    return %c0_i32, %c0_i32_0 : i32, i32
  }
  func.func @transform_2(%arg0: i32, %arg1: memref<1x2xi32, #tpu.memory_space<smem>>) -> (i32, i32) {
    %c0_i32 = arith.constant 0 : i32
    %c0_i32_0 = arith.constant 0 : i32
    %c0_i32_1 = arith.constant 0 : i32
    return %c0_i32, %c0_i32_0 : i32, i32
  }
  func.func @transform_3(%arg0: i32, %arg1: memref<1x2xi32, #tpu.memory_space<smem>>) -> (i32, i32) {
    %c0_i32 = arith.constant 0 : i32
    %c0_i32_0 = arith.constant 0 : i32
    %c0_i32_1 = arith.constant 0 : i32
    return %c0_i32, %c0_i32_0 : i32, i32
  }
  func.func @transform_4(%arg0: i32, %arg1: memref<1x2xi32, #tpu.memory_space<smem>>) -> (i32, i32) {
    %c0_i32 = arith.constant 0 : i32
    %c0_i32_0 = arith.constant 0 : i32
    %c0_i32_1 = arith.constant 0 : i32
    return %c0_i32, %c0_i32_0 : i32, i32
  }
  func.func @transform_5(%arg0: i32, %arg1: memref<1x2xi32, #tpu.memory_space<smem>>) -> (i32, i32) {
    %c0_i32 = arith.constant 0 : i32
    %c0_i32_0 = arith.constant 0 : i32
    %c0_i32_1 = arith.constant 0 : i32
    return %c0_i32, %c0_i32_0 : i32, i32
  }
  func.func @transform_6(%arg0: i32, %arg1: memref<1x2xi32, #tpu.memory_space<smem>>) -> (i32, i32, i32) {
    %c0_i32 = arith.constant 0 : i32
    %c0_i32_0 = arith.constant 0 : i32
    %c0_i32_1 = arith.constant 0 : i32
    return %arg0, %c0_i32, %c0_i32_0 : i32, i32, i32
  }
}

</mosaic_0001>

<bundles_post_ra>
// kernel: tpu_custom_call.1
= control target key start
LH: loop header
LB: loop body
LE: loop exit
PB: predicated region body
PF: predicated region fallthrough
CT: control target
= control target key end

     0   :  { %s290_s27 = smov [#allocation4]   ;;  %s420_s0 = inlined_call_operand.hbm [shape: s32[1,2], index: 0, kind: input, shape index: {}]   ;;  %s421_s1 = inlined_call_operand.vmem [shape: f32[64,32], index: 1, kind: input, shape index: {}]   ;;  %s422_s2 = inlined_call_operand.vmem [shape: f32[2,32], index: 2, kind: input, shape index: {}]   ;;  %s423_s3 = inlined_call_operand.vmem [shape: f32[64,128], index: 3, kind: input, shape index: {}]   ;;  %s424_s4 = inlined_call_operand.vmem [shape: f32[1,128], index: 4, kind: input, shape index: {}]   ;;  %s425_s5 = inlined_call_operand.vmem [shape: f32[32,64], index: 5, kind: input, shape index: {}]   ;;  %s426_s6 = inlined_call_operand.vmem [shape: f32[1,64], index: 6, kind: input, shape index: {}]   ;;  %s427_s7 = inlined_call_operand.hbm [shape: f32[1,2,128], index: 7, kind: output, shape index: {}]  }
   0x1   :  { %s13_s26 = sshll.u32 %s420_s0, 4  ;;  %s14_s26 = int_to_ptr.hbm [resolvable:$true] %s13_s26 }
   0x2   :  { %16 = dma.hbm_to_smem %s14_s26, 16, %s290_s27, [#allocation3] }
   0x3   :  { %286 = dma.done.wait [#allocation3], 16 }
   0x4   :  { %287 = vsyncadd [#allocation3], 4294967280 }
   0x5   :  { %19 = sfence }
   0x6   :  { %s42_s28 = sld [smem:[#allocation4]]  ;;  %v64_v0 = vld [vmem:[%s421_s1 + $0x38] sm:$0xff]  ;;  %v63_v1 = vld [vmem:[%s421_s1 + $0x30] sm:$0xff]  ;;  %v291_v2 = vmov 0   ;;  %v62_v3 = vld [vmem:[%s421_s1 + $0x28] sm:$0xff] }
   0x7   :  { %241 = vset.pattern.permute.xlu0 %v291_v2  ;;  %s228_s10 = sld [smem:[#allocation4 + $0x1]]  ;;  %77 = vmatpush.msra.mxu0 %v64_v0 }
   0x9   :  { %78 = vmatpush.msra.mxu0 %v63_v1 }
   0xa   :  { %20 = vsyncpa [#allocation6], 0  ;;  %v61_v4 = vld [vmem:[%s421_s1 + $0x20] sm:$0xff]  ;;  %vm47_vm0 = vcmask 1040384   ;;  %v60_v6 = vld [vmem:[%s421_s1 + $0x18] sm:$0xff]  ;;  %vm38_vm1 = vcmask 254976   ;;  %v49_v21 = vlaneseq }
   0xb   :  { %79 = vmatpush.msra.mxu0 %v62_v3  ;;  %v59_v9 = vld [vmem:[%s421_s1 + $0x10] sm:$0xff]  ;;  %v58_v10 = vld [vmem:[%s421_s1 + $0x8] sm:$0xff]  ;;  %v57_v11 = vld [vmem:[%s421_s1] sm:$0xff]  ;;  %s292_s0 = smov 32   ;;  %vm65_vm2 = vcmask 523264   ;;  %v293_v24 = vmov 0.0  }
   0xc   :  { %v43_v5 = vstv %s42_s28  ;;  %v37_v12 = vld [vmem:[%s422_s2] sm:$0x3]  ;;  %v102_v13 = vld [vmem:[%s423_s3 + $0x38] sm:$0xff]  ;;  %v101_v14 = vld [vmem:[%s423_s3 + $0x30] sm:$0xff]  ;;  %v50_v22 = vand.u32 127, %v49_v21  ;;  %vm93_vm4 = vcmask 261120  }
   0xd   :  { %v46_v7 = vstv %s228_s10  ;;  %80 = vmatpush.msra.mxu0 %v61_v4  ;;  %39 = vst.msk [vmem:[#allocation2] sm:$0x3] %vm38_vm1, %v37_v12  ;;  %118 = vmatpush.msra.mxu1 %v102_v13  ;;  %v100_v15 = vld [vmem:[%s423_s3 + $0x28] sm:$0xff]  ;;  %v99_v16 = vld [vmem:[%s423_s3 + $0x20] sm:$0xff]  ;;  %v98_v17 = vld [vmem:[%s423_s3 + $0x18] sm:$0xff]  ;;  %s219_s1 = sshll.u32 %s427_s7, 4  ;;  %s220_s1 = int_to_ptr.hbm [resolvable:$true] %s219_s1 }
   0xe   :  { %v48_v8 = vsel %vm47_vm0, %v43_v5, %v46_v7  ;;  %v97_v19 = vld [vmem:[%s423_s3 + $0x10] sm:$0xff]  ;;  %v96_v20 = vld [vmem:[%s423_s3 + $0x8] sm:$0xff]  ;;  %v95_v26 = vld [vmem:[%s423_s3] sm:$0xff]  ;;  %s294_s3 = smov 64   ;;  %vm209_vm9 = vcmask 785408  }
   0xf   :  { %52 = vperm.xlu0 %241, %v48_v8   ;;  %81 = vmatpush.msra.mxu0 %v60_v6  ;;  %v242_v30 = vld [vmem:[%s424_s4] ss:$0 sm:$0xff]  ;;  %s295_s4 = smov 96   ;;  %v177_v51 = vld [vmem:[%s425_s5 + $0x18] sm:$0xff]  ;;  %v176_v52 = vld [vmem:[%s425_s5 + $0x10] sm:$0xff] }
  0x10   :  { %119 = vmatpush.msra.mxu1 %v101_v14  ;;  %196 = vmatpush.msra.mxu2 %v177_v51  ;;  %v175_v53 = vld [vmem:[%s425_s5 + $0x8] sm:$0xff]  ;;  %v174_v54 = vld [vmem:[%s425_s5] sm:$0xff]  ;;  %s296_s5 = smov [#allocation5]  }
  0x11   :  { %82 = vmatpush.msra.mxu0 %v59_v9  ;;  %v243_v61 = vld [vmem:[%s426_s6] ss:$0 sm:$0xff]  ;;  %s217_s27 = sshll.u32 %s296_s5, 4  ;;  %s218_s27 = int_to_ptr.vmem [resolvable:$true] %s217_s27 }
  0x12   :  { %120 = vmatpush.msra.mxu1 %v100_v15  ;;  %197 = vmatpush.msra.mxu2 %v176_v52 }
  0x13   :  { %83 = vmatpush.msra.mxu0 %v58_v10 }
  0x14   :  { %121 = vmatpush.msra.mxu1 %v99_v16  ;;  %v40_v18 = vld [vmem:[#allocation2] sm:$0x3]  ;;  %198 = vmatpush.msra.mxu2 %v175_v53 }
  0x15   :  { %84 = vmatpush.msra.mxu0 %v57_v11 }
  0x16   :  { %122 = vmatpush.msra.mxu1 %v98_v17  ;;  %199 = vmatpush.msra.mxu2 %v174_v54 }
  0x17   :  { %90 = vrot.lane.b32.xlu0 %v40_v18, %s292_s0 }
  0x18   :  { %123 = vmatpush.msra.mxu1 %v97_v19 }
  0x1a   :  { %124 = vmatpush.msra.mxu1 %v96_v20 }
  0x1c   :  { %125 = vmatpush.msra.mxu1 %v95_v26 }
  0x81   :  { %v53_v23 = vpop.permute.xlu0 %52 }
  0x82   :  { %vm54_vm3 = vcmp.eq.s32.totalorder %v50_v22, %v53_v23 }
  0x83   :  { %v229_v25 = vsel %vm54_vm3, 1.0, %v293_v24 }
  0x84   :  { %230 = vmatmul.msk.f32.vlgmr.msra.gmra.mxu0 %vm65_vm2, %v229_v25 }
  0x89   :  { %v91_v27 = vpop.permute.xlu0 %90 }
 0x101   :  { %v86_v28 = vpop.f32.mrf.mxu0 }
 0x102   :  { %v94_v29 = vsel %vm93_vm4, %v86_v28, %v91_v27 }
 0x103   :  { %231 = vmatmul.msk.f32.vlgmr.msra.gmra.mxu1 %vm65_vm2, %v94_v29 }
 0x180   :  { %v127_v31 = vpop.f32.mrf.mxu1 }
 0x181   :  { %v128_v32 = vadd.f32 %v242_v30, %v127_v31 }
 0x183   :  { %150 = vrot.lane.b32.xlu1 %v128_v32, %s292_s0  ;;  %v232_v33 = vmul.f32 -1.442695, %v128_v32 }
 0x185   :  { %244 = vpow2.f32 %v232_v33 }
 0x18b   :  { %v245_v34 = vpop.eup %244 }
 0x18c   :  { %v133_v35 = vadd.f32 1.0, %v245_v34 }
 0x18e   :  { %246 = vrcp.f32 %v133_v35  ;;  %v145_v41 = vand.u32 2147483648, %v133_v35  ;;  %vm139_vm6 = vweird.f32 %v133_v35  ;;  %v143_v42 = vand.u32 2147483647, %v133_v35 }
 0x190   :  { %v146_v44 = vor.u32 1.1754944e-38, %v145_v41  ;;  %vm144_vm8 = vcmp.eq.f32.partialorder %v143_v42, 8.507059e+37 }
 0x194   :  { %v247_v36 = vpop.eup %246 }
 0x195   :  { %v135_v37 = vmul.f32 %v247_v36, %v133_v35  ;;  %vm140_vm5 = vweird.f32 %v247_v36 }
 0x196   :  { %vm141_vm7 = vmor %vm139_vm6, %vm140_vm5 }
 0x197   :  { %v136_v38 = vsub.f32 1.0, %v135_v37 }
 0x199   :  { %v137_v39 = vmul.f32 %v247_v36, %v136_v38 }
 0x19b   :  { %v138_v40 = vadd.f32 %v247_v36, %v137_v39 }
 0x19d   :  { %v142_v43 = vsel %vm141_vm7, %v247_v36, %v138_v40 }
 0x19e   :  { %v147_v46 = vsel %vm144_vm8, %v146_v44, %v142_v43 }
 0x19f   :  { %v160_v55 = vsub.f32 1.0, %v147_v46  ;;  %v166_v57 = vmul.f32 %v147_v46, %v91_v27 }
 0x1f5   :  { %v151_v45 = vpop.permute.xlu1 %150 }
 0x1f6   :  { %v153_v47 = vmul.f32 %v151_v45, %v147_v46 }
 0x1f8   :  { %155 = vrot.lane.b32.xlu1 %v153_v47, %s294_s3 }
 0x26a   :  { %v156_v48 = vpop.permute.xlu1 %155 }
 0x26b   :  { %v158_v49 = vadd.f32 %v156_v48, %v128_v32 }
 0x26d   :  { %248 = vtanh.f32 %v158_v49 }
 0x273   :  { %v249_v50 = vpop.eup %248 }
 0x274   :  { %162 = vrot.lane.b32.xlu2 %v249_v50, %s295_s4 }
 0x2ce   :  { %v163_v56 = vpop.permute.xlu2 %162 }
 0x2cf   :  { %v165_v58 = vmul.f32 %v163_v56, %v160_v55 }
 0x2d1   :  { %v167_v59 = vadd.f32 %v166_v57, %v165_v58 }
 0x2d3   :  { %169 = vrot.lane.b32.xlu2 %v167_v59, %s295_s4 }
 0x32d   :  { %v170_v60 = vpop.permute.xlu2 %169 }
 0x32e   :  { %173 = vst.msk [vmem:[#allocation2] sm:$0x3] %vm38_vm1, %v170_v60  ;;  %233 = vmatmul.msk.f32.vlgmr.msra.gmra.mxu2 %vm93_vm4, %v170_v60 }
 0x3b1   :  { %v201_v62 = vpop.f32.mrf.mxu2 }
 0x3b2   :  { %v202_v63 = vadd.f32 %v243_v61, %v201_v62 }
 0x3b4   :  { %205 = vrot.lane.b32.xlu0 %v202_v63, %s292_s0 }
 0x426   :  { %v206_v0 = vpop.permute.xlu0 %205 }
 0x427   :  { %v208_v1 = vsel %vm93_vm4, %v170_v60, %v206_v0 }
 0x428   :  { %v210_v2 = vsel %vm209_vm9, %v208_v1, 0.0 }
 0x429   :  { %211 = vst [vmem:[#allocation5] sm:$0x3] %v210_v2 }
 0x42a   :  { %222 = dma.vmem_to_hbm [thread:$0]  %s218_s27, 32, %s220_s1, [#allocation6]  }
 0x42b   :  { %288 = dma.done.wait [#allocation6], 32  }
 0x42c   :  { %289 = vsyncadd [#allocation6], 4294967264 }
 0x42d   :  { %227 = vsyncpa [#allocation6], 1 }

</bundles_post_ra>
